<compile_context>
chip_gen: v7x
topology: tpu7x:2x2x1
jax: 0.10.0
libtpu: 0.0.40
codegen_flags: <defaults>
</compile_context>

<pallas_src>
import functools

import jax
import jax.numpy as jnp
from jax.experimental import pallas as pl
from jax.experimental.pallas import tpu as pltpu


def _round_up(x, m):
    return ((x + m - 1) // m) * m


def _pad_to(a, shape):
    pads = [(0, t - s) for s, t in zip(a.shape, shape)]
    if any(p[1] for p in pads):
        return jnp.pad(a, pads)
    return a


def _choose_tile_b(n):
    # Big tiles amortize ~0.35us/grid-step overhead; keep >=2 grid steps so both
    # v7x TensorCores get work; multiples of 128 keep the lane-dense output
    # store unmasked; cap rows to keep vreg/VMEM pressure low.
    cap = 1024
    half = _round_up(max(1, (n + 1) // 2), 128)
    return int(min(cap, max(128, half)))


def _mlp_hidden(x_ref, w_in_ref, b_in_ref, wh_ref, bh_ref, *, n_layers, in_dim):
    """Input Linear+Tanh done on the VPU (K=in_dim is far too small for the MXU),
    then n_layers hidden Linear+Tanh layers on the MXU (f32 accumulation)."""
    x = x_ref[...]                                     # (TB, in_dim)
    w_in = w_in_ref[...]                               # (in_dim, Hp)
    pre = x[:, 0:1] * w_in[0:1, :] + b_in_ref[...]     # (TB, Hp) broadcast-FMA
    for j in range(1, in_dim):                         # in_dim is tiny & static
        pre = pre + x[:, j:j + 1] * w_in[j:j + 1, :]
    h = jnp.tanh(pre)
    for i in range(n_layers):                          # small & static -> unrolled
        h = jnp.tanh(
            jnp.dot(h, wh_ref[i], preferred_element_type=jnp.float32) + bh_ref[i]
        )
    return h                                           # (TB, Hp) f32


def pinn_kernel_lane_dense(x_ref, w_in_ref, b_in_ref, wh_ref, bh_ref,
                           w_out_ref, b_out_ref, o_ref, *, n_layers, in_dim):
    # out_dim == 1 specialization: output layer = elementwise multiply + lane
    # reduction (XLU slot, not MXU), stored lane-dense as a (1, TB) row.
    h = _mlp_hidden(x_ref, w_in_ref, b_in_ref, wh_ref, bh_ref,
                    n_layers=n_layers, in_dim=in_dim)
    out_vec = jnp.sum(h * w_out_ref[...], axis=-1)            # (TB,)
    o_ref[...] = (out_vec[None, :] + b_out_ref[...]).astype(o_ref.dtype)


def pinn_kernel_general(x_ref, w_in_ref, b_in_ref, wh_ref, bh_ref,
                        w_out_ref, b_out_ref, o_ref, *, n_layers, in_dim):
    # General out_dim path: keep the output layer on the MXU.
    h = _mlp_hidden(x_ref, w_in_ref, b_in_ref, wh_ref, bh_ref,
                    n_layers=n_layers, in_dim=in_dim)
    o_ref[...] = (
        jnp.dot(h, w_out_ref[...], preferred_element_type=jnp.float32)
        + b_out_ref[...]
    ).astype(o_ref.dtype)


def pinn_forward(x, params, *, n_layers, tile_b=None):
    """x: (N, input_size) float32. params: dict of pre-transposed weights."""
    assert n_layers >= 1, "stacked hidden-layer specs require n_layers >= 1"
    N, in_dim = x.shape
    H = params["w_in"].shape[1]
    out_dim = params["w_out"].shape[1]

    if tile_b is None:
        tile_b = _choose_tile_b(N)
    tile_b = int(max(128, _round_up(tile_b, 128)))

    # Zero-pad hidden width to a multiple of 128 lanes (math is unchanged).
    Hp = _round_up(H, 128)
    w_in = _pad_to(params["w_in"].astype(jnp.float32), (in_dim, Hp))
    b_in = _pad_to(params["b_in"].astype(jnp.float32), (1, Hp))
    wh = _pad_to(params["wh"].astype(jnp.float32), (n_layers, Hp, Hp))
    bh = _pad_to(params["bh"].astype(jnp.float32), (n_layers, 1, Hp))
    w_out = _pad_to(params["w_out"].astype(jnp.float32), (Hp, out_dim))
    b_out = params["b_out"].astype(jnp.float32)

    # Zero-pad batch to a tile multiple; padded rows are sliced off at the end.
    N_pad = _round_up(N, tile_b)
    x_p = _pad_to(x.astype(jnp.float32), (N_pad, in_dim))
    num_tiles = N_pad // tile_b

    # Grid-invariant parameter specs (same block every step).
    weight_specs = [
        pl.BlockSpec((in_dim, Hp), lambda i: (0, 0)),           # w_in
        pl.BlockSpec((1, Hp), lambda i: (0, 0)),                # b_in
        pl.BlockSpec((n_layers, Hp, Hp), lambda i: (0, 0, 0)),  # stacked hidden W
        pl.BlockSpec((n_layers, 1, Hp), lambda i: (0, 0, 0)),   # stacked hidden b
    ]

    flops = 2 * N_pad * (in_dim * Hp + n_layers * Hp * Hp + Hp * out_dim)
    transcendentals = N_pad * Hp * (n_layers + 1)
    bytes_accessed = 4 * int(x_p.size + w_in.size + b_in.size + wh.size
                             + bh.size + w_out.size + b_out.size
                             + N_pad * out_dim)
    cost = pl.CostEstimate(flops=int(flops),
                           transcendentals=int(transcendentals),
                           bytes_accessed=bytes_accessed)
    cparams = pltpu.CompilerParams(dimension_semantics=("parallel",))

    if out_dim == 1:
        kernel = functools.partial(pinn_kernel_lane_dense,
                                   n_layers=n_layers, in_dim=in_dim)
        out = pl.pallas_call(
            kernel,
            out_shape=jax.ShapeDtypeStruct((1, N_pad), jnp.float32),
            grid_spec=pltpu.PrefetchScalarGridSpec(
                num_scalar_prefetch=0,
                grid=(num_tiles,),
                in_specs=[pl.BlockSpec((tile_b, in_dim), lambda i: (i, 0))]
                + weight_specs
                + [pl.BlockSpec((1, Hp), lambda i: (0, 0)),   # w_out as a row
                   pl.BlockSpec((1, 1), lambda i: (0, 0))],   # b_out scalar
                out_specs=pl.BlockSpec((1, tile_b), lambda i: (0, i)),
            ),
            compiler_params=cparams,
            cost_estimate=cost,
        )(x_p, w_in, b_in, wh, bh, w_out.T, b_out)
        return out.reshape(N_pad, 1)[:N]
    else:
        kernel = functools.partial(pinn_kernel_general,
                                   n_layers=n_layers, in_dim=in_dim)
        out = pl.pallas_call(
            kernel,
            out_shape=jax.ShapeDtypeStruct((N_pad, out_dim), jnp.float32),
            grid_spec=pltpu.PrefetchScalarGridSpec(
                num_scalar_prefetch=0,
                grid=(num_tiles,),
                in_specs=[pl.BlockSpec((tile_b, in_dim), lambda i: (i, 0))]
                + weight_specs
                + [pl.BlockSpec((Hp, out_dim), lambda i: (0, 0)),
                   pl.BlockSpec((1, out_dim), lambda i: (0, 0))],
                out_specs=pl.BlockSpec((tile_b, out_dim), lambda i: (i, 0)),
            ),
            compiler_params=cparams,
            cost_estimate=cost,
        )(x_p, w_in, b_in, wh, bh, w_out, b_out)
        return out[:N]


def init_params(key, input_size, hidden_size, output_size, n_layers):
    """PyTorch-Linear-style uniform(-1/sqrt(fan_in), 1/sqrt(fan_in)) init.
    Weights stored pre-transposed as (in, out)."""
    def uniform(k, shape, fan_in):
        bound = 1.0 / jnp.sqrt(jnp.asarray(fan_in, jnp.float32))
        return jax.random.uniform(k, shape, jnp.float32, -bound, bound)

    keys = jax.random.split(key, 4 + 2 * n_layers)
    params = {
        "w_in": uniform(keys[0], (input_size, hidden_size), input_size),
        "b_in": uniform(keys[1], (1, hidden_size), input_size),
        "w_out": uniform(keys[2], (hidden_size, output_size), hidden_size),
        "b_out": uniform(keys[3], (1, output_size), hidden_size),
    }
    wh = [uniform(keys[4 + 2 * i], (hidden_size, hidden_size), hidden_size)
          for i in range(n_layers)]
    bh = [uniform(keys[5 + 2 * i], (1, hidden_size), hidden_size)
          for i in range(n_layers)]
    params["wh"] = jnp.stack(wh, axis=0)   # (n_layers, H, H)
    params["bh"] = jnp.stack(bh, axis=0)   # (n_layers, 1, H)
    return params


def pinn_reference(x, params, n_layers):
    h = jnp.tanh(x @ params["w_in"] + params["b_in"])
    for i in range(n_layers):
        h = jnp.tanh(h @ params["wh"][i] + params["bh"][i])
    return h @ params["w_out"] + params["b_out"]


if __name__ == "__main__":
    # Small shapes consistent with a Burgers PINN: x = (x-coord, t-coord) pairs.
    input_size, hidden_size, output_size, n_layers = 2, 32, 1, 2
    N = 256  # batch of collocation points

    key = jax.random.PRNGKey(0)
    k_params, k_x = jax.random.split(key)
    params = init_params(k_params, input_size, hidden_size, output_size, n_layers)

    x = jax.random.uniform(k_x, (N, input_size), jnp.float32, -1.0, 1.0)

    out = pinn_forward(x, params, n_layers=n_layers)
    out = jax.block_until_ready(out)

    ref = pinn_reference(x, params, n_layers)
    assert out.shape == (N, output_size)
    assert jnp.allclose(out, ref, atol=1e-5, rtol=1e-5), "mismatch vs reference"

    print("KERNEL_OK")
</pallas_src>

<mosaic_0001>
module attributes {stable_mosaic.version = 11 : i64} {
  func.func @pinn_kernel_lane_dense(%arg0: i32, %arg1: memref<128x2xf32, #tpu.memory_space<vmem>>, %arg2: memref<2x128xf32, #tpu.memory_space<vmem>>, %arg3: memref<1x128xf32, #tpu.memory_space<vmem>>, %arg4: memref<2x128x128xf32, #tpu.memory_space<vmem>>, %arg5: memref<2x1x128xf32, #tpu.memory_space<vmem>>, %arg6: memref<1x128xf32, #tpu.memory_space<vmem>>, %arg7: memref<1x1xf32, #tpu.memory_space<vmem>>, %arg8: memref<1x128xf32, #tpu.memory_space<vmem>>) attributes {dimension_semantics = [#tpu.dimension_semantics<parallel>], iteration_bounds = array<i64: 2>, scalar_prefetch = 0 : i64, scratch_operands = 0 : i64, tpu.core_type = #tpu.core_type<tc>, window_params = [{transform_indices = @transform_0, window_bounds = array<i64: 128, 2>}, {pipeline_mode = #tpu.pipeline_mode<synchronous>, transform_indices = @transform_1, window_bounds = array<i64: 2, 128>}, {pipeline_mode = #tpu.pipeline_mode<synchronous>, transform_indices = @transform_2, window_bounds = array<i64: 1, 128>}, {pipeline_mode = #tpu.pipeline_mode<synchronous>, transform_indices = @transform_3, window_bounds = array<i64: 2, 128, 128>}, {pipeline_mode = #tpu.pipeline_mode<synchronous>, transform_indices = @transform_4, window_bounds = array<i64: 2, 1, 128>}, {pipeline_mode = #tpu.pipeline_mode<synchronous>, transform_indices = @transform_5, window_bounds = array<i64: 1, 128>}, {pipeline_mode = #tpu.pipeline_mode<synchronous>, transform_indices = @transform_6, window_bounds = array<i64: 1, 1>}, {transform_indices = @transform_7, window_bounds = array<i64: 1, 128>}]} {
    %c0 = arith.constant 0 : index
    %c0_0 = arith.constant 0 : index
    %0 = vector.load %arg1[%c0, %c0_0] : memref<128x2xf32, #tpu.memory_space<vmem>>, vector<128x2xf32>
    %c0_1 = arith.constant 0 : index
    %c0_2 = arith.constant 0 : index
    %1 = vector.load %arg2[%c0_1, %c0_2] : memref<2x128xf32, #tpu.memory_space<vmem>>, vector<2x128xf32>
    %2 = vector.extract_strided_slice %0 {offsets = [0, 0], sizes = [128, 1], strides = [1, 1]} : vector<128x2xf32> to vector<128x1xf32>
    %3 = vector.extract_strided_slice %1 {offsets = [0, 0], sizes = [1, 128], strides = [1, 1]} : vector<2x128xf32> to vector<1x128xf32>
    %4 = vector.broadcast %2 : vector<128x1xf32> to vector<128x128xf32>
    %5 = vector.broadcast %3 : vector<1x128xf32> to vector<128x128xf32>
    %6 = arith.mulf %4, %5 : vector<128x128xf32>
    %c0_3 = arith.constant 0 : index
    %c0_4 = arith.constant 0 : index
    %7 = vector.load %arg3[%c0_3, %c0_4] : memref<1x128xf32, #tpu.memory_space<vmem>>, vector<1x128xf32>
    %8 = vector.broadcast %7 : vector<1x128xf32> to vector<128x128xf32>
    %9 = arith.addf %6, %8 : vector<128x128xf32>
    %10 = vector.extract_strided_slice %0 {offsets = [0, 1], sizes = [128, 1], strides = [1, 1]} : vector<128x2xf32> to vector<128x1xf32>
    %11 = vector.extract_strided_slice %1 {offsets = [1, 0], sizes = [1, 128], strides = [1, 1]} : vector<2x128xf32> to vector<1x128xf32>
    %12 = vector.broadcast %10 : vector<128x1xf32> to vector<128x128xf32>
    %13 = vector.broadcast %11 : vector<1x128xf32> to vector<128x128xf32>
    %14 = arith.mulf %12, %13 : vector<128x128xf32>
    %15 = arith.addf %9, %14 : vector<128x128xf32>
    %16 = math.tanh %15 : vector<128x128xf32>
    %c0_5 = arith.constant 0 : index
    %c0_6 = arith.constant 0 : index
    %c0_7 = arith.constant 0 : index
    %17 = vector.load %arg4[%c0_5, %c0_6, %c0_7] : memref<2x128x128xf32, #tpu.memory_space<vmem>>, vector<1x128x128xf32>
    %18 = vector.shape_cast %17 : vector<1x128x128xf32> to vector<128x128xf32>
    %cst = arith.constant dense<0.000000e+00> : vector<128x128xf32>
    %19 = tpu.matmul %16, %18, %cst {dimension_numbers = #tpu.dot_dimension_numbers<[1], [0], [0], [1], [0, 0, 1, 1], [], []>} : vector<128x128xf32>, vector<128x128xf32>, vector<128x128xf32> -> vector<128x128xf32>
    %c0_8 = arith.constant 0 : index
    %c0_9 = arith.constant 0 : index
    %c0_10 = arith.constant 0 : index
    %20 = vector.load %arg5[%c0_8, %c0_9, %c0_10] : memref<2x1x128xf32, #tpu.memory_space<vmem>>, vector<1x1x128xf32>
    %21 = vector.shape_cast %20 : vector<1x1x128xf32> to vector<1x128xf32>
    %22 = vector.broadcast %21 : vector<1x128xf32> to vector<128x128xf32>
    %23 = arith.addf %19, %22 : vector<128x128xf32>
    %24 = math.tanh %23 : vector<128x128xf32>
    %c1 = arith.constant 1 : index
    %c0_11 = arith.constant 0 : index
    %c0_12 = arith.constant 0 : index
    %25 = vector.load %arg4[%c1, %c0_11, %c0_12] : memref<2x128x128xf32, #tpu.memory_space<vmem>>, vector<1x128x128xf32>
    %26 = vector.shape_cast %25 : vector<1x128x128xf32> to vector<128x128xf32>
    %cst_13 = arith.constant dense<0.000000e+00> : vector<128x128xf32>
    %27 = tpu.matmul %24, %26, %cst_13 {dimension_numbers = #tpu.dot_dimension_numbers<[1], [0], [0], [1], [0, 0, 1, 1], [], []>} : vector<128x128xf32>, vector<128x128xf32>, vector<128x128xf32> -> vector<128x128xf32>
    %c1_14 = arith.constant 1 : index
    %c0_15 = arith.constant 0 : index
    %c0_16 = arith.constant 0 : index
    %28 = vector.load %arg5[%c1_14, %c0_15, %c0_16] : memref<2x1x128xf32, #tpu.memory_space<vmem>>, vector<1x1x128xf32>
    %29 = vector.shape_cast %28 : vector<1x1x128xf32> to vector<1x128xf32>
    %30 = vector.broadcast %29 : vector<1x128xf32> to vector<128x128xf32>
    %31 = arith.addf %27, %30 : vector<128x128xf32>
    %32 = math.tanh %31 : vector<128x128xf32>
    %c0_17 = arith.constant 0 : index
    %c0_18 = arith.constant 0 : index
    %33 = vector.load %arg6[%c0_17, %c0_18] : memref<1x128xf32, #tpu.memory_space<vmem>>, vector<1x128xf32>
    %34 = vector.broadcast %33 : vector<1x128xf32> to vector<128x128xf32>
    %35 = arith.mulf %32, %34 : vector<128x128xf32>
    %cst_19 = arith.constant dense<0.000000e+00> : vector<128xf32>
    %36 = vector.multi_reduction <add>, %35, %cst_19 [1] : vector<128x128xf32> to vector<128xf32>
    %37 = vector.shape_cast %36 : vector<128xf32> to vector<1x128xf32>
    %c0_20 = arith.constant 0 : index
    %c0_21 = arith.constant 0 : index
    %38 = vector.load %arg7[%c0_20, %c0_21] : memref<1x1xf32, #tpu.memory_space<vmem>>, vector<1x1xf32>
    %39 = vector.broadcast %38 : vector<1x1xf32> to vector<1x128xf32>
    %40 = arith.addf %37, %39 : vector<1x128xf32>
    %c0_22 = arith.constant 0 : index
    %c0_23 = arith.constant 0 : index
    %41 = vector.load %arg8[%c0_22, %c0_23] : memref<1x128xf32, #tpu.memory_space<vmem>>, vector<1x128xf32>
    tpu.vector_store %arg8[%c0_22, %c0_23], %40 {strides = array<i32>} : memref<1x128xf32, #tpu.memory_space<vmem>>, vector<1x128xf32>,
    return
  }
  func.func @transform_0(%arg0: i32) -> (i32, i32) {
    %c0_i32 = arith.constant 0 : i32
    %c0_i32_0 = arith.constant 0 : i32
    return %arg0, %c0_i32 : i32, i32
  }
  func.func @transform_1(%arg0: i32) -> (i32, i32) {
    %c0_i32 = arith.constant 0 : i32
    %c0_i32_0 = arith.constant 0 : i32
    %c0_i32_1 = arith.constant 0 : i32
    return %c0_i32, %c0_i32_0 : i32, i32
  }
  func.func @transform_2(%arg0: i32) -> (i32, i32) {
    %c0_i32 = arith.constant 0 : i32
    %c0_i32_0 = arith.constant 0 : i32
    %c0_i32_1 = arith.constant 0 : i32
    return %c0_i32, %c0_i32_0 : i32, i32
  }
  func.func @transform_3(%arg0: i32) -> (i32, i32, i32) {
    %c0_i32 = arith.constant 0 : i32
    %c0_i32_0 = arith.constant 0 : i32
    %c0_i32_1 = arith.constant 0 : i32
    %c0_i32_2 = arith.constant 0 : i32
    return %c0_i32, %c0_i32_0, %c0_i32_1 : i32, i32, i32
  }
  func.func @transform_4(%arg0: i32) -> (i32, i32, i32) {
    %c0_i32 = arith.constant 0 : i32
    %c0_i32_0 = arith.constant 0 : i32
    %c0_i32_1 = arith.constant 0 : i32
    %c0_i32_2 = arith.constant 0 : i32
    return %c0_i32, %c0_i32_0, %c0_i32_1 : i32, i32, i32
  }
  func.func @transform_5(%arg0: i32) -> (i32, i32) {
    %c0_i32 = arith.constant 0 : i32
    %c0_i32_0 = arith.constant 0 : i32
    %c0_i32_1 = arith.constant 0 : i32
    return %c0_i32, %c0_i32_0 : i32, i32
  }
  func.func @transform_6(%arg0: i32) -> (i32, i32) {
    %c0_i32 = arith.constant 0 : i32
    %c0_i32_0 = arith.constant 0 : i32
    %c0_i32_1 = arith.constant 0 : i32
    return %c0_i32, %c0_i32_0 : i32, i32
  }
  func.func @transform_7(%arg0: i32) -> (i32, i32) {
    %c0_i32 = arith.constant 0 : i32
    %c0_i32_0 = arith.constant 0 : i32
    return %c0_i32, %arg0 : i32, i32
  }
}

</mosaic_0001>

<bundles_post_ra>
// kernel: tpu_custom_call.1
= control target key start
LH: loop header
LB: loop body
LE: loop exit
PB: predicated region body
PF: predicated region fallthrough
CT: control target
= control target key end

     0   :  { %s2142_s0 = inlined_call_operand.vmem [shape: f32[256,2], index: 0, kind: input, shape index: {}]   ;;  %s2143_s1 = inlined_call_operand.vmem [shape: f32[2,128], index: 1, kind: input, shape index: {}]   ;;  %s2144_s2 = inlined_call_operand.vmem [shape: f32[1,128], index: 2, kind: input, shape index: {}]   ;;  %s2145_s3 = inlined_call_operand.vmem [shape: f32[2,128,128], index: 3, kind: input, shape index: {}]   ;;  %s2146_s4 = inlined_call_operand.vmem [shape: f32[2,1,128], index: 4, kind: input, shape index: {}]   ;;  %s2147_s5 = inlined_call_operand.vmem [shape: f32[1,128], index: 5, kind: input, shape index: {}]   ;;  %s2148_s6 = inlined_call_operand.<no memory space> [shape: f32[1,1], index: 6, kind: input, shape index: {}]   ;;  %s2149_s7 = inlined_call_operand.hbm [shape: f32[1,256], index: 7, kind: output, shape index: {}]  }
   0x1   :  { %v12_v0 = vstv %s2148_s6 }
   0x2   :  { %13 = vst [vmem:[#allocation2] sm:$0x1] %v12_v0 }
   0x3   :  { %14 = vsyncpa [#allocation4], 0 }
   0x4   :  { %16 = vsyncpa [#allocation4 + $0x1], 0  ;;  %s1721_s26 = smov 0   ;;  %s1723_s27 = smov 0  }
   0x5   :  { %s1725_s28 = smov 0   ;;  %s1727_s29 = smov 0  }
   0x6 LB: > { %s1183_s6 = sadd.s32 4294967295, %s1673_s29   ;;  %s1184_s30 = sadd.s32 4294967294, %s1673_s29   ;;  %s1673_s29 = sphi %s1727_s29, %s2155_s29   ;;  %s1669_s28 = sphi %s1725_s28, %s2154_s28   ;;  %s1665_s27 = sphi %s1723_s27, %s2153_s27   ;;  %s1661_s26 = sphi %s1721_s26, %s2152_s26  }
   0x7   : > { %s1744_s8 = sadd.s32 1, %s1673_s29   ;;  %s181_s9 = sadd.s32 1, %s1669_s28 }
   0x8   : > { %s178_s10 = ssub.s32 %s1673_s29, %s1744_s8  ;;  %p191_p0 = scmp.ne.s32.totalorder %s1669_s28, %s1665_s27 }
   0x9   : > { %p179_p1 = scmp.eq.s32.totalorder %s178_s10, 0  ;;  %p192_p2 = scmp.eq.s32.totalorder %s1183_s6, 1 }
   0xa   : > { %p197_p3 = scmp.ne.s32.totalorder %s1665_s27, %s1661_s26  ;;  %p198_p4 = scmp.eq.s32.totalorder %s1184_s30, 1 }
   0xb   : > { %s1754_s11 = scalar_select %p179_p1, %s1669_s28, %s181_s9  }
   0xc   : > { %p1756_p5 = por %p192_p2, %p191_p0  ;;  %p1760_p6 = por %p198_p4, %p197_p3 }
   0xd   : > { %p1187_p7 = scmp.ge.s32.totalorder %s1673_s29, 1  ;;  %p243_p8 = scmp.lt.s32.totalorder %s1673_s29, 3 }
   0xf   : > { %p244_p9 = pnand %p1187_p7, %p243_p8 }
  0x10   : > { %s1766_s14 = sshll.u32 (!%p244_p9), %s1183_s6, 4  ;;  %v1675_v1 = vmov (!%p244_p9), 1   ;;  %v536_v6 = vld [vmem:[%s2145_s3] sm:$0xff] (!%p244_p9)  ;;  %v537_v7 = vld [vmem:[%s2145_s3 + $0x8] sm:$0xff] (!%p244_p9)  ;;  %v538_v10 = vld [vmem:[%s2145_s3 + $0x10] sm:$0xff] (!%p244_p9)  ;;  %v1676_v14 = vmov (!%p244_p9), 0   ;;  %v377_v55 = vlaneseq (!%p244_p9) }
  0x11   : > { %247 = sbr.rel (%p244_p9) target bundleno = 878 (0x36e), region = 48  ;;  %1497 = vset.pattern.permute.xlu0 (!%p244_p9), %v1675_v1  ;;  %1495 = vset.pattern.permute.xlu1 (!%p244_p9), %v1675_v1  ;;  %p275_p10 = scmp.lt.s32.totalorder (!%p244_p9), %s1766_s14, 31  ;;  %v1390_v9 = vpack.c.bf16 (!%p244_p9), %v537_v7, %v536_v6  ;;  %v539_v11 = vld [vmem:[%s2145_s3 + $0x18] sm:$0xff] (!%p244_p9)  ;;  %v540_v15 = vld [vmem:[%s2145_s3 + $0x20] sm:$0xff] (!%p244_p9)  ;;  %v541_v16 = vld [vmem:[%s2145_s3 + $0x28] sm:$0xff] (!%p244_p9)  ;;  %vm1014_vm0 = vcmask (!%p244_p9), 130112  }
  0x12   : > { %v1394_v13 = vpack.c.bf16 (!%p244_p9), %v539_v11, %v538_v10  ;;  %v1398_v17 = vpack.c.bf16 (!%p244_p9), %v541_v16, %v540_v15  ;;  %v542_v18 = vld [vmem:[%s2145_s3 + $0x30] sm:$0xff] (!%p244_p9)  ;;  %v543_v19 = vld [vmem:[%s2145_s3 + $0x38] sm:$0xff] (!%p244_p9)  ;;  %v544_v22 = vld [vmem:[%s2145_s3 + $0x40] sm:$0xff] (!%p244_p9)  ;;  %v1884_v58 = vshrl.u32 (!%p244_p9), %v377_v55, 7  ;;  %vm1021_vm1 = vcmask (!%p244_p9), 195712   ;;  %s272_s21 = sand.u32 (!%p244_p9), 1, %s1665_s27   ;;  %s2100_s6 = scalar_lea.hbm (!%p244_p9), %s2149_s7, %s1766_s14 }
  0x13   : > { %1391 = vmatprep.subr.bf16.mxu0 (!%p244_p9), %v1390_v9  ;;  %v1402_v20 = vpack.c.bf16 (!%p244_p9), %v543_v19, %v542_v18  ;;  %v545_v23 = vld [vmem:[%s2145_s3 + $0x48] sm:$0xff] (!%p244_p9)  ;;  %v546_v25 = vld [vmem:[%s2145_s3 + $0x50] sm:$0xff] (!%p244_p9)  ;;  %v547_v26 = vld [vmem:[%s2145_s3 + $0x58] sm:$0xff] (!%p244_p9)  ;;  %vm1028_vm2 = vcmask (!%p244_p9), 261312   ;;  %vm1035_vm3 = vcmask (!%p244_p9), 326912   ;;  %vm1042_vm4 = vcmask (!%p244_p9), 392512  }
  0x14   : > { %1393 = vmatpush3.bf16.msra.mxu0 (!%p244_p9), %v1390_v9  ;;  %v1406_v24 = vpack.c.bf16 (!%p244_p9), %v545_v23, %v544_v22  ;;  %v1410_v28 = vpack.c.bf16 (!%p244_p9), %v547_v26, %v546_v25  ;;  %v548_v29 = vld [vmem:[%s2145_s3 + $0x60] sm:$0xff] (!%p244_p9)  ;;  %v549_v30 = vld [vmem:[%s2145_s3 + $0x68] sm:$0xff] (!%p244_p9)  ;;  %v550_v32 = vld [vmem:[%s2145_s3 + $0x70] sm:$0xff] (!%p244_p9)  ;;  %v486_v61 = vsub.s32 (!%p244_p9), 1, %v1884_v58  ;;  %v379_v63 = vsub.s32 (!%p244_p9), 0, %v1884_v58  ;;  %s273_s22 = scalar_lea.vmem (!%p244_p9), [#allocation3], %s272_s21 }
  0x15   : > { %1395 = vmatprep.subr.bf16.mxu0 (!%p244_p9), %v1394_v13  ;;  %v1414_v31 = vpack.c.bf16 (!%p244_p9), %v549_v30, %v548_v29  ;;  %v551_v33 = vld [vmem:[%s2145_s3 + $0x78] sm:$0xff] (!%p244_p9)  ;;  %v1192_v43 = vld [vmem:[%s2145_s3 + $0x80] sm:$0xff] (!%p244_p9)  ;;  %v1193_v44 = vld [vmem:[%s2145_s3 + $0x88] sm:$0xff] (!%p244_p9)  ;;  %vm1049_vm5 = vcmask (!%p244_p9), 458112   ;;  %vm1056_vm6 = vcmask (!%p244_p9), 523712   ;;  %vm1063_vm7 = vcmask (!%p244_p9), 589312  }
  0x16   : > { %v1418_v36 = vpack.c.bf16 (!%p244_p9), %v551_v33, %v550_v32  ;;  %v1194_v45 = vld [vmem:[%s2145_s3 + $0x90] sm:$0xff] (!%p244_p9)  ;;  %v1422_v46 = vpack.c.bf16 (!%p244_p9), %v1193_v44, %v1192_v43  ;;  %v1195_v47 = vld [vmem:[%s2145_s3 + $0x98] sm:$0xff] (!%p244_p9)  ;;  %v1196_v49 = vld [vmem:[%s2145_s3 + $0xa0] sm:$0xff] (!%p244_p9)  ;;  %vm1070_vm8 = vcmask (!%p244_p9), 654912   ;;  %vm1077_vm9 = vcmask (!%p244_p9), 720512   ;;  %s1129_s23 = sshll.u32 (!%p244_p9), %s273_s22, 4  ;;  %s2102_s23 = int_to_ptr.vmem [resolvable:$true] %s1129_s23 }
  0x17   : > { %v1426_v48 = vpack.c.bf16 (!%p244_p9), %v1195_v47, %v1194_v45  ;;  %v1197_v50 = vld [vmem:[%s2145_s3 + $0xa8] sm:$0xff] (!%p244_p9)  ;;  %v1198_v52 = vld [vmem:[%s2145_s3 + $0xb0] sm:$0xff] (!%p244_p9)  ;;  %v1199_v53 = vld [vmem:[%s2145_s3 + $0xb8] sm:$0xff] (!%p244_p9)  ;;  %vm1084_vm10 = vcmask (!%p244_p9), 786112   ;;  %vm1091_vm11 = vcmask (!%p244_p9), 851712   ;;  %vm1098_vm12 = vcmask (!%p244_p9), 917312  }
  0x18   : > { %s276_s15 = scalar_select %p275_p10, %s1766_s14, 31  ;;  %1397 = vmatpush3.bf16.msra.mxu0 %v1394_v13  ;;  %1423 = vmatprep.subr.bf16.mxu1 %v1422_v46  ;;  %v1430_v51 = vpack.c.bf16 %v1197_v50, %v1196_v49  ;;  %v1434_v54 = vpack.c.bf16 %v1199_v53, %v1198_v52  ;;  %v296_v0 = vld [vmem:[%s2143_s1] sm:$0x3]  ;;  %vm1105_vm13 = vcmask 982912   ;;  %vm1112_vm14 = vcmask 1048512  }
  0x19   : > { %1399 = vmatprep.subr.bf16.mxu0 %v1398_v17  ;;  %1425 = vmatpush3.bf16.msra.mxu1 %v1422_v46  ;;  %v1903_v7 = vld [vmem:[%s2144_s2] ss:$0 sm:$0xff]  ;;  %s1117_s30 = scalar_lea.sflag [#allocation4], %s272_s21  ;;  %s1611_s9 = scalar_lea.vmem %s2102_s23, 16 }
  0x1a   : > { %s1189_s16 = sshll.u32 %s276_s15, 3  ;;  %1427 = vmatprep.subr.bf16.mxu1 %v1426_v48  ;;  %p1612_p11 = scmp.ne.s32.totalorder %s2102_s23, %s1611_s9 }
  0x1b   : > { %s1775_s19 = scalar_lea.vmem %s2142_s0, %s1189_s16  ;;  %s1677_s10 = smov [#allocation3]  }
  0x1c   : > { %v282_v2 = vld [vmem:[%s1775_s19 + $0x10] sm:$0xff]  ;;  %v280_v3 = vld [vmem:[%s1775_s19] sm:$0xff]  ;;  %v281_v5 = vld [vmem:[%s1775_s19 + $0x8] sm:$0xff]  ;;  %1401 = vmatpush3.bf16.msra.mxu0 %v1398_v17  ;;  %p1613_p12 = pnand %p1612_p11, %p1756_p5 }
  0x1d   : > { %429 = vperm.xlu0 %1497, %v282_v2   ;;  %421 = vperm.xlu1 %1495, %v280_v3   ;;  %v286_v4 = vld [vmem:[%s1775_s19 + $0x30] sm:$0xff]  ;;  %v283_v12 = vld [vmem:[%s1775_s19 + $0x18] sm:$0xff]  ;;  %v284_v21 = vld [vmem:[%s1775_s19 + $0x20] sm:$0xff] }
  0x1e   : > { %v290_v8 = vld [vmem:[%s1775_s19 + $0x50] sm:$0xff]  ;;  %1403 = vmatprep.subr.bf16.mxu0 %v1402_v20  ;;  %v285_v27 = vld [vmem:[%s1775_s19 + $0x28] sm:$0xff]  ;;  %v287_v35 = vld [vmem:[%s1775_s19 + $0x38] sm:$0xff]  ;;  %1429 = vmatpush3.bf16.msra.mxu1 %v1426_v48  ;;  %p1614_p13 = pneg %p1613_p12 }
  0x1f   : > { %v289_v34 = vld [vmem:[%s1775_s19 + $0x48] sm:$0xff]  ;;  %v288_v38 = vld [vmem:[%s1775_s19 + $0x40] sm:$0xff]  ;;  %v294_v39 = vld [vmem:[%s1775_s19 + $0x70] sm:$0xff]  ;;  %1431 = vmatprep.subr.bf16.mxu1 %v1430_v51 }
  0x20   : > { %1405 = vmatpush3.bf16.msra.mxu0 %v1402_v20  ;;  %v293_v37 = vld [vmem:[%s1775_s19 + $0x68] sm:$0xff]  ;;  %v291_v40 = vld [vmem:[%s1775_s19 + $0x58] sm:$0xff]  ;;  %v292_v41 = vld [vmem:[%s1775_s19 + $0x60] sm:$0xff] }
  0x21   : > { %445 = vperm.xlu0 %1497, %v286_v4   ;;  %425 = vperm.xlu1 %1495, %v281_v5   ;;  %v295_v42 = vld [vmem:[%s1775_s19 + $0x78] sm:$0xff]  ;;  %s1615_s19 = sshll.u32 %s1677_s10, 4  ;;  %s1616_s19 = int_to_ptr.vmem [resolvable:$false] %s1615_s19 }
  0x22   : > { %1407 = vmatprep.subr.bf16.mxu0 %v1406_v24  ;;  %1433 = vmatpush3.bf16.msra.mxu1 %v1430_v51  ;;  %s1617_s15 = scalar_lea.vmem %s1616_s19, 32  ;;  %p1618_p0 = scmp.lt.s32.totalorder %s2102_s23, %s1616_s19 }
  0x23   : > { %1435 = vmatprep.subr.bf16.mxu1 %v1434_v54  ;;  %p1619_p1 = scmp.lt.s32.totalorder %s1617_s15, %s1611_s9 }
  0x24   : > { %1409 = vmatpush3.bf16.msra.mxu0 %v1406_v24 }
  0x25   : > { %461 = vperm.xlu0 %1497, %v290_v8   ;;  %1496 = vset.pattern.permute.xlu1 %v1676_v14  ;;  %p1620_p2 = por %p1619_p1, %p1618_p0 }
  0x26   : > { %314 = vperm.xlu1 %1496, %v283_v12   ;;  %1411 = vmatprep.subr.bf16.mxu0 %v1410_v28 }
  0x27   : > { %1437 = vmatpush3.bf16.msra.mxu1 %v1434_v54  ;;  %p1621_p3 = pnand %p1620_p2, %p1614_p13 }
  0x28   : > { %1413 = vmatpush3.bf16.msra.mxu0 %v1410_v28 }
  0x29   : > { %1506 = vset.pattern.permute.xlu0 %v1676_v14  ;;  %1415 = vmatprep.subr.bf16.mxu0 %v1414_v31 }
  0x2a   : > { %299 = vperm.xlu0 %1506, %v280_v3   ;;  %1498 = vset.pattern.permute.xlu1 %v1675_v1  ;;  %v1897_v3 = vrot.slane %v296_v0, %v379_v63 }
  0x2b   : > { %433 = vperm.xlu1 %1498, %v283_v12  }
  0x2c   : > { %1417 = vmatpush3.bf16.msra.mxu0 %v1414_v31 }
  0x2d   : > { %1419 = vmatprep.subr.bf16.mxu0 %v1418_v36 }
  0x2e   : > { %304 = vperm.xlu0 %1506, %v281_v5  }
  0x2f   : > { %1499 = vset.pattern.permute.xlu1 %v1676_v14 }
  0x30   : > { %319 = vperm.xlu1 %1499, %v284_v21   ;;  %1421 = vmatpush3.bf16.msra.mxu0 %v1418_v36 }
  0x32   : > { %309 = vperm.xlu0 %1506, %v282_v2   ;;  %v1893_v2 = vrot.slane %v296_v0, %v486_v61 }
  0x34   : > { %1500 = vset.pattern.permute.xlu1 %v1675_v1 }
  0x35   : > { %437 = vperm.xlu1 %1500, %v284_v21  }
  0x36   : > { %324 = vperm.xlu0 %1506, %v285_v27  }
  0x39   : > { %441 = vperm.xlu1 %1500, %v285_v27  }
  0x3a   : > { %329 = vperm.xlu0 %1506, %v286_v4  }
  0x3d   : > { %1501 = vset.pattern.permute.xlu1 %v1676_v14 }
  0x3e   : > { %344 = vperm.xlu0 %1506, %v289_v34   ;;  %334 = vperm.xlu1 %1501, %v287_v35  }
  0x42   : > { %349 = vperm.xlu0 %1506, %v290_v8   ;;  %1502 = vset.pattern.permute.xlu1 %v1675_v1 }
  0x43   : > { %449 = vperm.xlu1 %1502, %v287_v35  }
  0x46   : > { %364 = vperm.xlu0 %1506, %v293_v37  }
  0x47   : > { %1503 = vset.pattern.permute.xlu1 %v1676_v14 }
  0x48   : > { %339 = vperm.xlu1 %1503, %v288_v38  }
  0x4a   : > { %369 = vperm.xlu0 %1506, %v294_v39  }
  0x4c   : > { %1504 = vset.pattern.permute.xlu1 %v1675_v1 }
  0x4d   : > { %453 = vperm.xlu1 %1504, %v288_v38  }
  0x4e   : > { %1511 = vset.pattern.permute.xlu0 %v1675_v1 }
  0x4f   : > { %477 = vperm.xlu0 %1511, %v294_v39  }
  0x51   : > { %457 = vperm.xlu1 %1504, %v289_v34  }
  0x53   : > { %1514 = vset.pattern.permute.xlu0 %v1676_v14 }
  0x55   : > { %1505 = vset.pattern.permute.xlu1 %v1676_v14 }
  0x56   : > { %354 = vperm.xlu1 %1505, %v291_v40  }
  0x5a   : > { %1507 = vset.pattern.permute.xlu1 %v1675_v1 }
  0x5b   : > { %465 = vperm.xlu1 %1507, %v291_v40  }
  0x5f   : > { %1508 = vset.pattern.permute.xlu1 %v1676_v14 }
  0x60   : > { %359 = vperm.xlu1 %1508, %v292_v41  }
  0x64   : > { %1509 = vset.pattern.permute.xlu1 %v1675_v1 }
  0x65   : > { %469 = vperm.xlu1 %1509, %v292_v41  }
  0x69   : > { %473 = vperm.xlu1 %1509, %v293_v37  }
  0x6d   : > { %1510 = vset.pattern.permute.xlu1 %v1676_v14 }
  0x6e   : > { %374 = vperm.xlu1 %1510, %v295_v42  }
  0x72   : > { %1512 = vset.pattern.permute.xlu1 %v1675_v1 }
  0x73   : > { %481 = vperm.xlu1 %1512, %v295_v42  }
  0x77   : > { %1513 = vset.pattern.permute.xlu1 %v1676_v14 }
  0x9c   : > { %v430_v56 = vpop.permute.xlu0 %429  ;;  %v422_v57 = vpop.permute.xlu1 %421 }
  0x9d   : > { %v488_v8 = vmul.f32 %v1893_v2, %v422_v57  ;;  %v490_v24 = vmul.f32 %v1893_v2, %v430_v56 }
  0xa0   : > { %v446_v59 = vpop.permute.xlu0 %445  ;;  %v426_v60 = vpop.permute.xlu1 %425 }
  0xa1   : > { %v489_v16 = vmul.f32 %v1893_v2, %v426_v60  ;;  %v494_v40 = vmul.f32 %v1893_v2, %v446_v59 }
  0xa4   : > { %v1887_v62 = vpop.permute.xlu0 %461 }
  0xa5   : > { %v315_v1 = vpop.permute.xlu1 %314 }
  0xa6   : > { %v384_v10 = vmul.f32 %v1897_v3, %v315_v1 }
  0xa8   : > { %v407_v18 = vadd.f32 %v1903_v7, %v384_v10 }
  0xa9   : > { %v300_v4 = vpop.permute.xlu0 %299 }
  0xaa   : > { %v381_v5 = vmul.f32 %v1897_v3, %v300_v4  ;;  %v434_v6 = vpop.permute.xlu1 %433 }
  0xab   : > { %v491_v14 = vmul.f32 %v1893_v2, %v434_v6 }
  0xac   : > { %v404_v9 = vadd.f32 %v1903_v7, %v381_v5 }
  0xad   : > { %v305_v11 = vpop.permute.xlu0 %304  ;;  %v507_v23 = vadd.f32 %v491_v14, %v407_v18 }
  0xae   : > { %v382_v12 = vmul.f32 %v1897_v3, %v305_v11  ;;  %v504_v13 = vadd.f32 %v488_v8, %v404_v9  ;;  %v498_v9 = vmul.f32 %v1893_v2, %v1887_v62 }
  0xaf   : > { %v320_v15 = vpop.permute.xlu1 %319 }
  0xb0   : > { %v405_v17 = vadd.f32 %v1903_v7, %v382_v12  ;;  %1515 = vtanh.f32 %v504_v13  ;;  %v385_v19 = vmul.f32 %v1897_v3, %v320_v15 }
  0xb1   : > { %v310_v20 = vpop.permute.xlu0 %309 }
  0xb2   : > { %v505_v21 = vadd.f32 %v489_v16, %v405_v17  ;;  %v383_v22 = vmul.f32 %v1897_v3, %v310_v20  ;;  %v408_v27 = vadd.f32 %v1903_v7, %v385_v19 }
  0xb4   : > { %1517 = vtanh.f32 %v505_v21  ;;  %v406_v25 = vadd.f32 %v1903_v7, %v383_v22  ;;  %v438_v26 = vpop.permute.xlu1 %437 }
  0xb5   : > { %v492_v28 = vmul.f32 %v1893_v2, %v438_v26  ;;  %v325_v29 = vpop.permute.xlu0 %324  ;;  %1519 = vtanh.f32 %v507_v23 }
  0xb6   : > { %v506_v30 = vadd.f32 %v490_v24, %v406_v25  ;;  %v386_v31 = vmul.f32 %v1897_v3, %v325_v29 }
  0xb7   : > { %v508_v32 = vadd.f32 %v492_v28, %v408_v27 }
  0xb8   : > { %1521 = vtanh.f32 %v506_v30  ;;  %v409_v33 = vadd.f32 %v1903_v7, %v386_v31  ;;  %v442_v34 = vpop.permute.xlu1 %441 }
  0xb9   : > { %1523 = vtanh.f32 %v508_v32  ;;  %v493_v35 = vmul.f32 %v1893_v2, %v442_v34  ;;  %v330_v36 = vpop.permute.xlu0 %329 }
  0xba   : > { %v1516_v37 = vpop.eup %1515  ;;  %v387_v38 = vmul.f32 %v1897_v3, %v330_v36 }
  0xbb   : > { %v509_v39 = vadd.f32 %v493_v35, %v409_v33  ;;  %1310 = vmatprep.mubr.f32.mxu0 %v1516_v37 }
  0xbc   : > { %v410_v41 = vadd.f32 %v1903_v7, %v387_v38 }
  0xbd   : > { %1525 = vtanh.f32 %v509_v39  ;;  %v335_v42 = vpop.permute.xlu1 %334  ;;  %v345_v47 = vpop.permute.xlu0 %344 }
  0xbe   : > { %v1518_v43 = vpop.eup %1517  ;;  %v510_v44 = vadd.f32 %v494_v40, %v410_v41  ;;  %v388_v45 = vmul.f32 %v1897_v3, %v335_v42  ;;  %v390_v1 = vmul.f32 %v1897_v3, %v345_v47 }
  0xbf   : > { %1311 = vmatmul.mubr.f32.vlgmr.msra.gmra.mrb[0].mxu0 %v1518_v43  ;;  %v1520_v46 = vpop.eup %1519 }
  0xc0   : > { %1527 = vtanh.f32 %v510_v44  ;;  %v411_v51 = vadd.f32 %v1903_v7, %v388_v45  ;;  %v413_v12 = vadd.f32 %v1903_v7, %v390_v1 }
  0xc1   : > { %v350_v56 = vpop.permute.xlu0 %349 }
  0xc2   : > { %v1522_v48 = vpop.eup %1521  ;;  %v450_v49 = vpop.permute.xlu1 %449  ;;  %v391_v61 = vmul.f32 %v1897_v3, %v350_v56 }
  0xc3   : > { %v1524_v50 = vpop.eup %1523  ;;  %v495_v52 = vmul.f32 %v1893_v2, %v450_v49  ;;  %1313 = vmatprep.mubr.f32.mxu0 %v1522_v48 }
  0xc4   : > { %1314 = vmatmul.mubr.f32.gmra.mrb[2].mxu0 %v1520_v46  ;;  %v414_v6 = vadd.f32 %v1903_v7, %v391_v61  ;;  %v1206_v61 = vld [vmem:[%s2145_s3 + $0xf0] sm:$0xff] }
  0xc5   : > { %v511_v53 = vadd.f32 %v495_v52, %v411_v51  ;;  %1316 = vmatprep.mubr.f32.mxu0 %v1524_v50  ;;  %v365_v17 = vpop.permute.xlu0 %364 }
  0xc6   : > { %v514_v14 = vadd.f32 %v498_v9, %v414_v6  ;;  %v394_v31 = vmul.f32 %v1897_v3, %v365_v17 }
  0xc7   : > { %v1526_v54 = vpop.eup %1525  ;;  %1529 = vtanh.f32 %v511_v53  ;;  %v340_v57 = vpop.permute.xlu1 %339  ;;  %v1200_v53 = vld [vmem:[%s2145_s3 + $0xc0] sm:$0xff] }
  0xc8   : > { %1317 = vmatmul.mubr.f32.gmra.mrb[4].mxu0 %v1526_v54  ;;  %v389_v59 = vmul.f32 %v1897_v3, %v340_v57  ;;  %v417_v39 = vadd.f32 %v1903_v7, %v394_v31  ;;  %v1203_v54 = vld [vmem:[%s2145_s3 + $0xd8] sm:$0xff]  ;;  %v1204_v57 = vld [vmem:[%s2145_s3 + $0xe0] sm:$0xff] }
  0xc9   : > { %v370_v22 = vpop.permute.xlu0 %369 }
  0xca   : > { %v1528_v60 = vpop.eup %1527  ;;  %v412_v4 = vadd.f32 %v1903_v7, %v389_v59  ;;  %v395_v29 = vmul.f32 %v1897_v3, %v370_v22  ;;  %v1205_v59 = vld [vmem:[%s2145_s3 + $0xe8] sm:$0xff] }
  0xcb   : > { %1319 = vmatprep.mubr.f32.mxu0 %v1528_v60  ;;  %v1446_v60 = vpack.c.bf16 %v1205_v59, %v1204_v57 }
  0xcc   : > { %v454_v0 = vpop.permute.xlu1 %453  ;;  %v418_v36 = vadd.f32 %v1903_v7, %v395_v29 }
  0xcd   : > { %v496_v5 = vmul.f32 %v1893_v2, %v454_v0  ;;  %v1207_v0 = vld [vmem:[%s2145_s3 + $0xf8] sm:$0xff] }
  0xce   : > { %v478_v28 = vpop.permute.xlu0 %477  ;;  %v1450_v1 = vpack.c.bf16 %v1207_v0, %v1206_v61 }
  0xcf   : > { %v512_v8 = vadd.f32 %v496_v5, %v412_v4  ;;  %v502_v34 = vmul.f32 %v1893_v2, %v478_v28  ;;  %v1980_v4 = vld [vmem:[%s2146_s4] ss:$0 sm:$0xff] }
  0xd0   : > { %v458_v10 = vpop.permute.xlu1 %457 }
  0xd1   : > { %v1530_v11 = vpop.eup %1529  ;;  %1531 = vtanh.f32 %v512_v8  ;;  %v497_v13 = vmul.f32 %v1893_v2, %v458_v10  ;;  %v518_v41 = vadd.f32 %v502_v34, %v418_v36 }
  0xd2   : > { %1320 = vmatmul.mubr.f32.gmra.mrb[6].mxu0 %v1530_v11 }
  0xd3   : > { %v513_v15 = vadd.f32 %v497_v13, %v413_v12 }
  0xd5   : > { %1533 = vtanh.f32 %v513_v15  ;;  %v355_v16 = vpop.permute.xlu1 %354 }
  0xd6   : > { %1535 = vtanh.f32 %v514_v14  ;;  %v392_v18 = vmul.f32 %v1897_v3, %v355_v16 }
  0xd8   : > { %v415_v62 = vadd.f32 %v1903_v7, %v392_v18 }
  0xda   : > { %v466_v19 = vpop.permute.xlu1 %465 }
  0xdb   : > { %v1532_v20 = vpop.eup %1531  ;;  %v499_v21 = vmul.f32 %v1893_v2, %v466_v19 }
  0xdc   : > { %1322 = vmatprep.mubr.f32.mxu0 %v1532_v20 }
  0xdd   : > { %v515_v23 = vadd.f32 %v499_v21, %v415_v62 }
  0xdf   : > { %v1534_v24 = vpop.eup %1533  ;;  %1537 = vtanh.f32 %v515_v23  ;;  %v360_v25 = vpop.permute.xlu1 %359 }
  0xe0   : > { %v1536_v26 = vpop.eup %1535  ;;  %1323 = vmatmul.mubr.f32.gmra.mrb[8].mxu0 %v1534_v24  ;;  %v393_v27 = vmul.f32 %v1897_v3, %v360_v25 }
  0xe1   : > { %1325 = vmatprep.mubr.f32.mxu0 %v1536_v26 }
  0xe2   : > { %v416_v32 = vadd.f32 %v1903_v7, %v393_v27 }
  0xe4   : > { %v470_v30 = vpop.permute.xlu1 %469 }
  0xe5   : > { %v500_v33 = vmul.f32 %v1893_v2, %v470_v30 }
  0xe7   : > { %v516_v35 = vadd.f32 %v500_v33, %v416_v32 }
  0xe8   : > { %v474_v37 = vpop.permute.xlu1 %473 }
  0xe9   : > { %v1538_v38 = vpop.eup %1537  ;;  %1539 = vtanh.f32 %v516_v35  ;;  %v501_v40 = vmul.f32 %v1893_v2, %v474_v37 }
  0xea   : > { %1326 = vmatmul.mubr.f32.gmra.mrb[10].mxu0 %v1538_v38 }
  0xeb   : > { %v517_v42 = vadd.f32 %v501_v40, %v417_v39 }
  0xed   : > { %1541 = vtanh.f32 %v517_v42  ;;  %v375_v43 = vpop.permute.xlu1 %374 }
  0xee   : > { %1543 = vtanh.f32 %v518_v41  ;;  %v396_v44 = vmul.f32 %v1897_v3, %v375_v43  ;;  %v1201_v3 = vld [vmem:[%s2145_s3 + $0xc8] sm:$0xff] }
  0xf0   : > { %v419_v47 = vadd.f32 %v1903_v7, %v396_v44  ;;  %v1438_v7 = vpack.c.bf16 %v1201_v3, %v1200_v53  ;;  %v2001_v53 = vld [vmem:[%s2146_s4 + $0x1] ss:$0 sm:$0xff] }
  0xf2   : > { %v482_v45 = vpop.permute.xlu1 %481  ;;  %1439 = vmatprep.subr.bf16.mxu1 %v1438_v7 }
  0xf3   : > { %v1540_v46 = vpop.eup %1539  ;;  %v503_v48 = vmul.f32 %v1893_v2, %v482_v45  ;;  %1441 = vmatpush3.bf16.msra.mxu1 %v1438_v7  ;;  %v1202_v2 = vld [vmem:[%s2145_s3 + $0xd0] sm:$0xff] }
  0xf4   : > { %1328 = vmatprep.mubr.f32.mxu0 %v1540_v46  ;;  %v1442_v56 = vpack.c.bf16 %v1203_v54, %v1202_v2 }
  0xf5   : > { %v519_v49 = vadd.f32 %v503_v48, %v419_v47 }
  0xf6   : > { %1443 = vmatprep.subr.bf16.mxu1 %v1442_v56 }
  0xf7   : > { %v1542_v50 = vpop.eup %1541  ;;  %1545 = vtanh.f32 %v519_v49  ;;  %1445 = vmatpush3.bf16.msra.mxu1 %v1442_v56 }
  0xf8   : > { %v1544_v51 = vpop.eup %1543  ;;  %1329 = vmatmul.mubr.f32.gmra.mrb[12].mxu0 %v1542_v50  ;;  %1447 = vmatprep.subr.bf16.mxu1 %v1446_v60 }
  0xf9   : > { %1331 = vmatprep.mubr.f32.mxu0 %v1544_v51 }
  0xfb   : > { %1449 = vmatpush3.bf16.msra.mxu1 %v1446_v60 }
  0xfc   : > { %1451 = vmatprep.subr.bf16.mxu1 %v1450_v1 }
  0xff   : > { %1453 = vmatpush3.bf16.msra.mxu1 %v1450_v1 }
 0x101   : > { %v1546_v52 = vpop.eup %1545 }
 0x102   : > { %1332 = vmatmul.mubr.f32.gmra.mrb[14].mxu0 %v1546_v52 }
 0x192   : > { %v1312_v5 = vpop.f32.mrb[0].mxu0 }
 0x193   : > { %v631_v6 = vadd.f32 %v1312_v5, %v1980_v4  ;;  %v625_v8 = vpop.f32.mrb[1].mxu0  ;;  %v2012_v5 = vld [vmem:[%s2147_s5] ss:$0 sm:$0xff] }
 0x194   : > { %v626_v9 = vadd.f32 %v1980_v4, %v625_v8 }
 0x196   : > { %1547 = vtanh.f32 %v626_v9 }
 0x197   : > { %1549 = vtanh.f32 %v631_v6  ;;  %v1315_v10 = vpop.f32.mrb[2].mxu0 }
 0x198   : > { %v641_v11 = vadd.f32 %v1315_v10, %v1980_v4  ;;  %v635_v12 = vpop.f32.mrb[3].mxu0 }
 0x199   : > { %v636_v13 = vadd.f32 %v1980_v4, %v635_v12 }
 0x19b   : > { %1551 = vtanh.f32 %v636_v13  ;;  %v1318_v14 = vpop.f32.mrb[4].mxu0 }
 0x19c   : > { %1553 = vtanh.f32 %v641_v11  ;;  %v651_v15 = vadd.f32 %v1318_v14, %v1980_v4  ;;  %v645_v16 = vpop.f32.mrb[5].mxu0 }
 0x19d   : > { %v646_v17 = vadd.f32 %v1980_v4, %v645_v16 }
 0x19f   : > { %1555 = vtanh.f32 %v646_v17 }
 0x1a0   : > { %v1548_v18 = vpop.eup %1547  ;;  %1557 = vtanh.f32 %v651_v15 }
 0x1a1   : > { %v1550_v19 = vpop.eup %1549  ;;  %1366 = vmatprep.mubr.f32.mxu1 %v1548_v18 }
 0x1a2   : > { %1367 = vmatmul.mubr.f32.vlgmr.msra.gmra.mrb[0].mxu1 %v1550_v19 }
 0x1a5   : > { %v1552_v20 = vpop.eup %1551  ;;  %v1321_v62 = vpop.f32.mrb[6].mxu0 }
 0x1a6   : > { %v1554_v21 = vpop.eup %1553  ;;  %v661_v22 = vadd.f32 %v1321_v62, %v1980_v4  ;;  %v655_v23 = vpop.f32.mrb[7].mxu0  ;;  %1369 = vmatprep.mubr.f32.mxu1 %v1552_v20 }
 0x1a7   : > { %v656_v24 = vadd.f32 %v1980_v4, %v655_v23  ;;  %1370 = vmatmul.mubr.f32.gmra.mrb[2].mxu1 %v1554_v21 }
 0x1a9   : > { %v1556_v25 = vpop.eup %1555  ;;  %1559 = vtanh.f32 %v656_v24 }
 0x1aa   : > { %v1558_v26 = vpop.eup %1557  ;;  %1561 = vtanh.f32 %v661_v22  ;;  %1372 = vmatprep.mubr.f32.mxu1 %v1556_v25 }
 0x1ab   : > { %1373 = vmatmul.mubr.f32.gmra.mrb[4].mxu1 %v1558_v26 }
 0x1b3   : > { %v1560_v27 = vpop.eup %1559  ;;  %v1324_v28 = vpop.f32.mrb[8].mxu0 }
 0x1b4   : > { %v1562_v29 = vpop.eup %1561  ;;  %v671_v30 = vadd.f32 %v1324_v28, %v1980_v4  ;;  %v665_v31 = vpop.f32.mrb[9].mxu0  ;;  %1375 = vmatprep.mubr.f32.mxu1 %v1560_v27 }
 0x1b5   : > { %v666_v32 = vadd.f32 %v1980_v4, %v665_v31  ;;  %1376 = vmatmul.mubr.f32.gmra.mrb[6].mxu1 %v1562_v29 }
 0x1b7   : > { %1563 = vtanh.f32 %v666_v32 }
 0x1b8   : > { %1565 = vtanh.f32 %v671_v30  ;;  %v961_v30 = vld [vmem:[#allocation2] sm:$0x1] }
 0x1bd   : > { %v1327_v33 = vpop.f32.mrb[10].mxu0 }
 0x1be   : > { %v681_v34 = vadd.f32 %v1327_v33, %v1980_v4  ;;  %v675_v35 = vpop.f32.mrb[11].mxu0 }
 0x1bf   : > { %v676_v36 = vadd.f32 %v1980_v4, %v675_v35 }
 0x1c1   : > { %v1564_v37 = vpop.eup %1563  ;;  %1567 = vtanh.f32 %v676_v36 }
 0x1c2   : > { %v1566_v38 = vpop.eup %1565  ;;  %1569 = vtanh.f32 %v681_v34  ;;  %1378 = vmatprep.mubr.f32.mxu1 %v1564_v37 }
 0x1c3   : > { %1379 = vmatmul.mubr.f32.gmra.mrb[8].mxu1 %v1566_v38 }
 0x1cb   : > { %v1568_v39 = vpop.eup %1567  ;;  %v1330_v40 = vpop.f32.mrb[12].mxu0 }
 0x1cc   : > { %v1570_v41 = vpop.eup %1569  ;;  %v691_v42 = vadd.f32 %v1330_v40, %v1980_v4  ;;  %v685_v43 = vpop.f32.mrb[13].mxu0  ;;  %1381 = vmatprep.mubr.f32.mxu1 %v1568_v39 }
 0x1cd   : > { %v686_v44 = vadd.f32 %v1980_v4, %v685_v43  ;;  %1382 = vmatmul.mubr.f32.gmra.mrb[10].mxu1 %v1570_v41 }
 0x1cf   : > { %1571 = vtanh.f32 %v686_v44 }
 0x1d0   : > { %1573 = vtanh.f32 %v691_v42 }
 0x1d5   : > { %v1333_v45 = vpop.f32.mrb[14].mxu0 }
 0x1d6   : > { %v701_v46 = vadd.f32 %v1333_v45, %v1980_v4  ;;  %v695_v47 = vpop.f32.mrb[15].mxu0 }
 0x1d7   : > { %v696_v48 = vadd.f32 %v1980_v4, %v695_v47 }
 0x1d9   : > { %v1572_v49 = vpop.eup %1571  ;;  %1575 = vtanh.f32 %v696_v48 }
 0x1da   : > { %v1574_v50 = vpop.eup %1573  ;;  %1577 = vtanh.f32 %v701_v46  ;;  %1384 = vmatprep.mubr.f32.mxu1 %v1572_v49 }
 0x1db   : > { %1385 = vmatmul.mubr.f32.gmra.mrb[12].mxu1 %v1574_v50 }
 0x1e3   : > { %v1576_v51 = vpop.eup %1575 }
 0x1e4   : > { %v1578_v52 = vpop.eup %1577  ;;  %1387 = vmatprep.mubr.f32.mxu1 %v1576_v51 }
 0x1e5   : > { %1388 = vmatmul.mubr.f32.gmra.mrb[14].mxu1 %v1578_v52 }
 0x275   : > { %v1368_v3 = vpop.f32.mrb[0].mxu1 }
 0x276   : > { %v817_v7 = vadd.f32 %v1368_v3, %v2001_v53  ;;  %v811_v2 = vpop.f32.mrb[1].mxu1 }
 0x277   : > { %v812_v54 = vadd.f32 %v2001_v53, %v811_v2 }
 0x278   : > { %1579 = vtanh.f32 %v817_v7 }
 0x279   : > { %1581 = vtanh.f32 %v812_v54 }
 0x27a   : > { %v1371_v56 = vpop.f32.mrb[2].mxu1 }
 0x27b   : > { %v827_v57 = vadd.f32 %v1371_v56, %v2001_v53  ;;  %v821_v59 = vpop.f32.mrb[3].mxu1 }
 0x27c   : > { %v822_v60 = vadd.f32 %v2001_v53, %v821_v59 }
 0x27d   : > { %1583 = vtanh.f32 %v827_v57 }
 0x27e   : > { %1585 = vtanh.f32 %v822_v60  ;;  %v1374_v61 = vpop.f32.mrb[4].mxu1 }
 0x27f   : > { %v837_v0 = vadd.f32 %v1374_v61, %v2001_v53  ;;  %v831_v1 = vpop.f32.mrb[5].mxu1 }
 0x280   : > { %v832_v4 = vadd.f32 %v2001_v53, %v831_v1 }
 0x281   : > { %1587 = vtanh.f32 %v837_v0 }
 0x282   : > { %v1580_v6 = vpop.eup %1579  ;;  %1589 = vtanh.f32 %v832_v4  ;;  %v2041_v4 = vand.u32 127, %v377_v55 }
 0x283   : > { %v1582_v8 = vpop.eup %1581  ;;  %v914_v9 = vmul.f32 %v1580_v6, %v2012_v5 }
 0x284   : > { %v913_v10 = vmul.f32 %v1582_v8, %v2012_v5 }
 0x285   : > { %931 = vadd.xlane.f32.xlu0 %v914_v9 }
 0x286   : > { %929 = vadd.xlane.f32.xlu1 %v913_v10  ;;  %v1009_v10 = vadd.s32 4294967288, %v2041_v4 }
 0x287   : > { %v1584_v11 = vpop.eup %1583 }
 0x288   : > { %v1586_v12 = vpop.eup %1585  ;;  %v1377_v13 = vpop.f32.mrb[6].mxu1  ;;  %v916_v14 = vmul.f32 %v1584_v11, %v2012_v5  ;;  %v1007_v11 = vsub.s32 %v2041_v4, %v1884_v58 }
 0x289   : > { %v847_v15 = vadd.f32 %v1377_v13, %v2001_v53  ;;  %v841_v16 = vpop.f32.mrb[7].mxu1  ;;  %v915_v17 = vmul.f32 %v1586_v12, %v2012_v5  ;;  %v1012_v12 = vsub.s32 %v1009_v10, %v1884_v58  ;;  %v1093_v10 = vadd.s32 4294967192, %v2041_v4 }
 0x28a   : > { %v842_v18 = vadd.f32 %v2001_v53, %v841_v16  ;;  %935 = vadd.xlane.f32.xlu1 %v916_v14 }
 0x28b   : > { %v1588_v19 = vpop.eup %1587  ;;  %1591 = vtanh.f32 %v847_v15  ;;  %933 = vadd.xlane.f32.xlu0 %v915_v17 }
 0x28c   : > { %v1590_v20 = vpop.eup %1589  ;;  %v918_v62 = vmul.f32 %v1588_v19, %v2012_v5  ;;  %1593 = vtanh.f32 %v842_v18 }
 0x28d   : > { %v917_v21 = vmul.f32 %v1590_v20, %v2012_v5  ;;  %v1030_v20 = vadd.s32 4294967264, %v2041_v4 }
 0x28e   : > { %939 = vadd.xlane.f32.xlu1 %v918_v62 }
 0x28f   : > { %937 = vadd.xlane.f32.xlu0 %v917_v21 }
 0x295   : > { %v1592_v22 = vpop.eup %1591 }
 0x296   : > { %v1380_v23 = vpop.f32.mrb[8].mxu1  ;;  %v920_v24 = vmul.f32 %v1592_v22, %v2012_v5  ;;  %v1594_v25 = vpop.eup %1593 }
 0x297   : > { %v857_v26 = vadd.f32 %v1380_v23, %v2001_v53  ;;  %v851_v27 = vpop.f32.mrb[9].mxu1  ;;  %v919_v29 = vmul.f32 %v1594_v25, %v2012_v5  ;;  %v1037_v25 = vadd.s32 4294967256, %v2041_v4 }
 0x298   : > { %v852_v28 = vadd.f32 %v2001_v53, %v851_v27  ;;  %943 = vadd.xlane.f32.xlu0 %v920_v24  ;;  %v1044_v24 = vadd.s32 4294967248, %v2041_v4  ;;  %v1033_v27 = vsub.s32 %v1030_v20, %v1884_v58 }
 0x299   : > { %1595 = vtanh.f32 %v857_v26 }
 0x29a   : > { %1597 = vtanh.f32 %v852_v28 }
 0x29c   : > { %941 = vadd.xlane.f32.xlu0 %v919_v29 }
 0x29f   : > { %964 = vperm.xlu1 %1513, %v961_v30   ;;  %v1051_v30 = vadd.s32 4294967240, %v2041_v4 }
 0x2a0   : > { %v1383_v31 = vpop.f32.mrb[10].mxu1 }
 0x2a1   : > { %v861_v32 = vpop.f32.mrb[11].mxu1  ;;  %v867_v43 = vadd.f32 %v1383_v31, %v2001_v53 }
 0x2a2   : > { %v862_v33 = vadd.f32 %v2001_v53, %v861_v32  ;;  %v1058_v32 = vadd.s32 4294967232, %v2041_v4 }
 0x2a3   : > { %v1596_v34 = vpop.eup %1595 }
 0x2a4   : > { %1599 = vtanh.f32 %v862_v33  ;;  %v922_v35 = vmul.f32 %v1596_v34, %v2012_v5  ;;  %v1598_v36 = vpop.eup %1597  ;;  %v1047_v33 = vsub.s32 %v1044_v24, %v1884_v58 }
 0x2a5   : > { %v921_v37 = vmul.f32 %v1598_v36, %v2012_v5 }
 0x2a6   : > { %947 = vadd.xlane.f32.xlu0 %v922_v35  ;;  %v1040_v35 = vsub.s32 %v1037_v25, %v1884_v58 }
 0x2aa   : > { %945 = vadd.xlane.f32.xlu0 %v921_v37 }
 0x2ae   : > { %v1600_v38 = vpop.eup %1599  ;;  %v1386_v39 = vpop.f32.mrb[12].mxu1 }
 0x2af   : > { %v877_v40 = vadd.f32 %v1386_v39, %v2001_v53  ;;  %v871_v41 = vpop.f32.mrb[13].mxu1  ;;  %v923_v42 = vmul.f32 %v1600_v38, %v2012_v5 }
 0x2b0   : > { %v872_v44 = vadd.f32 %v2001_v53, %v871_v41  ;;  %v1065_v41 = vadd.s32 4294967224, %v2041_v4 }
 0x2b1   : > { %1601 = vtanh.f32 %v877_v40  ;;  %949 = vadd.xlane.f32.xlu0 %v923_v42  ;;  %v1054_v40 = vsub.s32 %v1051_v30, %v1884_v58  ;;  %v1061_v42 = vsub.s32 %v1058_v32, %v1884_v58 }
 0x2b2   : > { %1603 = vtanh.f32 %v872_v44 }
 0x2b3   : > { %1605 = vtanh.f32 %v867_v43 }
 0x2b8   : > { %v1389_v45 = vpop.f32.mrb[14].mxu1 }
 0x2b9   : > { %v881_v46 = vpop.f32.mrb[15].mxu1  ;;  %v887_v47 = vadd.f32 %v1389_v45, %v2001_v53 }
 0x2ba   : > { %v882_v48 = vadd.f32 %v2001_v53, %v881_v46  ;;  %v1072_v46 = vadd.s32 4294967216, %v2041_v4 }
 0x2bb   : > { %v1602_v49 = vpop.eup %1601 }
 0x2bc   : > { %1607 = vtanh.f32 %v882_v48  ;;  %v926_v50 = vmul.f32 %v1602_v49, %v2012_v5  ;;  %v1604_v51 = vpop.eup %1603 }
 0x2bd   : > { %v1606_v52 = vpop.eup %1605  ;;  %1609 = vtanh.f32 %v887_v47  ;;  %v925_v3 = vmul.f32 %v1604_v51, %v2012_v5 }
 0x2be   : > { %955 = vadd.xlane.f32.xlu0 %v926_v50  ;;  %v924_v7 = vmul.f32 %v1606_v52, %v2012_v5  ;;  %v1079_v50 = vadd.s32 4294967208, %v2041_v4  ;;  %v1068_v52 = vsub.s32 %v1065_v41, %v1884_v58 }
 0x2c2   : > { %953 = vadd.xlane.f32.xlu0 %v925_v3 }
 0x2c3   : > { %951 = vadd.xlane.f32.xlu1 %v924_v7 }
 0x2c6   : > { %v1608_v2 = vpop.eup %1607 }
 0x2c7   : > { %v927_v54 = vmul.f32 %v1608_v2, %v2012_v5  ;;  %v1610_v56 = vpop.eup %1609  ;;  %v1075_v2 = vsub.s32 %v1072_v46, %v1884_v58 }
 0x2c8   : > { %v928_v53 = vmul.f32 %v1610_v56, %v2012_v5  ;;  %v1016_v5 = vadd.s32 4294967280, %v2041_v4 }
 0x2c9   : > { %957 = vadd.xlane.f32.xlu0 %v927_v54 }
 0x2ca   : > { %v1019_v15 = vsub.s32 %v1016_v5, %v1884_v58  ;;  %v1100_v5 = vadd.s32 4294967184, %v2041_v4 }
 0x2cd   : > { %959 = vadd.xlane.f32.xlu0 %v928_v53 }
 0x312   : > { %v932_v59 = vpop.xlane.xlu0 %931 }
 0x313   : > { %v930_v57 = vpop.xlane.xlu1 %929 }
 0x317   : > { %v936_v60 = vpop.xlane.xlu1 %935 }
 0x318   : > { %v934_v61 = vpop.xlane.xlu0 %933 }
 0x31b   : > { %v940_v0 = vpop.xlane.xlu1 %939 }
 0x31c   : > { %v938_v1 = vpop.xlane.xlu0 %937 }
 0x31f   : > { %v965_v6 = vpop.permute.xlu1 %964 }
 0x320   : > { %v2045_v9 = vrot.slane %v965_v6, %v379_v63  ;;  %v1023_v63 = vadd.s32 4294967272, %v2041_v4 }
 0x322   : > { %v971_v14 = vadd.f32 %v2045_v9, %v930_v57  ;;  %v972_v55 = vadd.f32 %v2045_v9, %v932_v59  ;;  %v973_v16 = vadd.f32 %v2045_v9, %v934_v61  ;;  %v1026_v21 = vsub.s32 %v1023_v63, %v1884_v58 }
 0x323   : > { %v974_v22 = vadd.f32 %v2045_v9, %v936_v60  ;;  %v975_v28 = vadd.f32 %v2045_v9, %v938_v1  ;;  %v976_v36 = vadd.f32 %v2045_v9, %v940_v0  ;;  %v1082_v57 = vsub.s32 %v1079_v50, %v1884_v58 }
 0x324   : > { %v1008_v17 = vrot.slane %v971_v14, %v1007_v11  ;;  %v1013_v18 = vrot.slane %v972_v55, %v1012_v12  ;;  %v1020_v62 = vrot.slane %v973_v16, %v1019_v15  ;;  %v1086_v59 = vadd.s32 4294967200, %v2041_v4 }
 0x325   : > { %v944_v8 = vpop.xlane.xlu0 %943  ;;  %v1027_v31 = vrot.slane %v974_v22, %v1026_v21  ;;  %v1034_v39 = vrot.slane %v975_v28, %v1033_v27  ;;  %v1041_v48 = vrot.slane %v976_v36, %v1040_v35  ;;  %v1107_v15 = vadd.s32 4294967176, %v2041_v4 }
 0x326   : > { %v1015_v23 = vsel %vm1014_vm0, %v1013_v18, %v1008_v17  ;;  %v978_v47 = vadd.f32 %v2045_v9, %v944_v8  ;;  %v1096_v63 = vsub.s32 %v1093_v10, %v1884_v58  ;;  %v1103_v17 = vsub.s32 %v1100_v5, %v1884_v58 }
 0x327   : > { %v1022_v29 = vsel %vm1021_vm1, %v1020_v62, %v1015_v23  ;;  %v1110_v22 = vsub.s32 %v1107_v15, %v1884_v58 }
 0x328   : > { %v1029_v37 = vsel %vm1028_vm2, %v1027_v31, %v1022_v29  ;;  %v1055_v56 = vrot.slane %v978_v47, %v1054_v40 }
 0x329   : > { %v942_v13 = vpop.xlane.xlu0 %941  ;;  %v1036_v43 = vsel %vm1035_vm3, %v1034_v39, %v1029_v37 }
 0x32a   : > { %v977_v34 = vadd.f32 %v2045_v9, %v942_v13  ;;  %v1043_v51 = vsel %vm1042_vm4, %v1041_v48, %v1036_v43  ;;  %v1089_v13 = vsub.s32 %v1086_v59, %v1884_v58 }
 0x32c   : > { %v1048_v44 = vrot.slane %v977_v34, %v1047_v33 }
 0x32e   : > { %v1050_v3 = vsel %vm1049_vm5, %v1048_v44, %v1043_v51 }
 0x32f   : > { %v1057_v61 = vsel %vm1056_vm6, %v1055_v56, %v1050_v3 }
 0x333   : > { %v948_v19 = vpop.xlane.xlu0 %947 }
 0x334   : > { %v980_v53 = vadd.f32 %v2045_v9, %v948_v19 }
 0x336   : > { %v1069_v11 = vrot.slane %v980_v53, %v1068_v52 }
 0x337   : > { %v946_v26 = vpop.xlane.xlu0 %945 }
 0x338   : > { %v979_v45 = vadd.f32 %v2045_v9, %v946_v26 }
 0x33a   : > { %v1062_v7 = vrot.slane %v979_v45, %v1061_v42 }
 0x33c   : > { %v1064_v6 = vsel %vm1063_vm7, %v1062_v7, %v1057_v61 }
 0x33d   : > { %v1071_v55 = vsel %vm1070_vm8, %v1069_v11, %v1064_v6 }
 0x33e   : > { %v950_v38 = vpop.xlane.xlu0 %949 }
 0x33f   : > { %v981_v54 = vadd.f32 %v2045_v9, %v950_v38 }
 0x341   : > { %v1076_v8 = vrot.slane %v981_v54, %v1075_v2 }
 0x343   : > { %v1078_v16 = vsel %vm1077_vm9, %v1076_v8, %v1071_v55 }
 0x34b   : > { %v956_v49 = vpop.xlane.xlu0 %955 }
 0x34c   : > { %v984_v19 = vadd.f32 %v2045_v9, %v956_v49 }
 0x34e   : > { %v1097_v25 = vrot.slane %v984_v19, %v1096_v63 }
 0x34f   : > { %v954_v0 = vpop.xlane.xlu0 %953 }
 0x350   : > { %v952_v60 = vpop.xlane.xlu1 %951  ;;  %v983_v14 = vadd.f32 %v2045_v9, %v954_v0 }
 0x351   : > { %v982_v1 = vadd.f32 %v2045_v9, %v952_v60 }
 0x352   : > { %v1090_v21 = vrot.slane %v983_v14, %v1089_v13 }
 0x353   : > { %v1083_v12 = vrot.slane %v982_v1, %v1082_v57 }
 0x355   : > { %v1085_v20 = vsel %vm1084_vm10, %v1083_v12, %v1078_v16 }
 0x356   : > { %v958_v18 = vpop.xlane.xlu0 %957  ;;  %v1092_v23 = vsel %vm1091_vm11, %v1090_v21, %v1085_v20 }
 0x357   : > { %v985_v62 = vadd.f32 %v2045_v9, %v958_v18  ;;  %v1099_v28 = vsel %vm1098_vm12, %v1097_v25, %v1092_v23 }
 0x359   : > { %v1104_v24 = vrot.slane %v985_v62, %v1103_v17 }
 0x35a   : > { %v960_v4 = vpop.xlane.xlu0 %959 }
 0x35b   : > { %v986_v26 = vadd.f32 %v2045_v9, %v960_v4  ;;  %v1106_v29 = vsel %vm1105_vm13, %v1104_v24, %v1099_v28 }
 0x35d   : > { %v1111_v27 = vrot.slane %v986_v26, %v1110_v22 }
 0x35f   : > { %v1113_v58 = vsel %vm1112_vm14, %v1111_v27, %v1106_v29 }
 0x360   : > { %1115 = vst [vmem:[%s273_s22] sm:$0x1] %v1113_v58 }
 0x361   : > { %1624 = shalt.err (!%p1621_p3)
}
 0x362   : > { %s1625_s14 = scalar_lea.hbm %s2100_s6, 16  ;;  %s1629_s18 = scalar_lea.hbm %s2149_s7, 32 }
 0x363   : > { %p1626_p4 = scmp.ne.s32.totalorder %s2100_s6, %s1625_s14  ;;  %p1630_p9 = scmp.lt.u32.totalorder %s2100_s6, %s2149_s7 }
 0x364   : > { %p1631_p10 = scmp.lt.u32.totalorder %s1629_s18, %s1625_s14  ;;  %p1633_p12 = scmp.lt.u32.totalorder %s1625_s14, %s2100_s6 }
 0x365   : > { %p1627_p7 = pnand %p1626_p4, %p1756_p5 }
 0x366   : > { %p1632_p11 = por %p1631_p10, %p1630_p9 }
 0x367   : > { %p1628_p8 = pneg %p1627_p7 }
 0x368   : > { %p1634_p13 = por %p1633_p12, %p1632_p11 }
 0x36a   : > { %p1635_p0 = pnand %p1634_p13, %p1628_p8 }
 0x36c   : > { %1638 = shalt.err (!%p1635_p0)
}
 0x36d   : > { %1454 = dma.vmem_to_hbm [thread:$0]  (%p1756_p5), %s2102_s23, 16, %s2100_s6, %s1117_s30  }
 0x36e PF: > { %p1460_p1 = scmp.ge.s32.totalorder %s1673_s29, 2  ;;  %s1141_s22 = sand.u32 1, %s1661_s26  }
 0x36f   : > { %s1142_s24 = scalar_lea.sflag [#allocation4], %s1141_s22 }
 0x370   : > { %p1457_p2 = pnand %p1460_p1, %p1760_p6 }
 0x372   : > { %1656 = dma.done.wait (!%p1457_p2), %s1142_s24, 16  }
 0x373   : > { %1658 = vsyncadd (!%p1457_p2), %s1142_s24, 4294967280  ;;  %p19_p3 = scmp.ge.s32.totalorder %s1744_s8, 4   ;;  %s2152_s26 = smov %s1665_s27 }
 0x374   : > { %s2153_s27 = smov %s1669_s28  ;;  %s2154_s28 = smov %s1754_s11 }
 0x375   : > { %s2155_s29 = smov %s1744_s8  ;;  %21 = sbr.rel (!%p19_p3) target bundleno = 6 (0x6), region = 85 }
 0x37c   :  { %1146 = vsyncpa [#allocation4], 1 }
 0x37d   :  { %1148 = vsyncpa [#allocation4 + $0x1], 1 }

</bundles_post_ra>
